<compile_context>
chip_gen: v6e
topology: v6e:2x2x1
jax: 0.10.0
libtpu: 0.0.40
codegen_flags: <defaults>
</compile_context>

<pallas_src>
import functools
import math

import jax
import jax.numpy as jnp
from jax.experimental import pallas as pl
from jax.experimental.pallas import tpu as pltpu

TIMESTEPS = 1000
NUM_CLASSES = 5
_BN_EPS = 1e-5
_LANE = 128
_NEG = -3.0e38  # finite fp32 sentinel for masked max

# Conservative scoped-VMEM request: fine on v5e/v6e (128 MiB) and under v7x's 64 MiB/TC.
_VMEM_LIMIT = 40 * 1024 * 1024


def _cparams(*dims):
    return pltpu.CompilerParams(
        dimension_semantics=dims, vmem_limit_bytes=_VMEM_LIMIT
    )


def _round_up(x, m):
    return ((x + m - 1) // m) * m


def _pick_center_tile(s, per_center_bytes, target_bytes=3 << 20, cap=512):
    """Centers-per-tile sized for ~target_bytes per (double-buffered) input block —
    re-derived for v7x's 64 MiB VMEM; single tile when a batch's centers fit."""
    s8 = _round_up(s, 8)
    tc = max(8, min(cap, target_bytes // max(1, per_center_bytes)))
    tc = max(8, (tc // 8) * 8)
    if tc >= s8:
        return s8
    if tc >= 128:
        tc = (tc // 128) * 128
    return tc


# ----------------------------- Pallas kernels --------------------------------


def _fused_mlp_kernel(*refs, nlayers, relu_flags):
    # refs = (x_ref, w1, b1, ..., wN, bN, o_ref)
    x_ref = refs[0]
    o_ref = refs[1 + 2 * nlayers]
    h = x_ref[...]  # [TR, Cin] bf16
    for i in range(nlayers):
        w = refs[1 + 2 * i][...]        # [Ci, Co] bf16 (BN scale folded in)
        b = refs[2 + 2 * i][...]        # [1, Co]  f32  (BN shift folded in)
        y = jnp.dot(h, w, preferred_element_type=jnp.float32) + b
        if relu_flags[i]:
            y = jnp.maximum(y, 0.0)
        h = y.astype(jnp.bfloat16) if i < nlayers - 1 else y
    o_ref[...] = h.astype(o_ref.dtype)


def _edge_mlp_max_kernel(*refs, nlayers, relu_flags, g):
    # refs = (msg_ref[G,TS,Cin], cnt_ref[TS,1], w1, b1, ..., wN, bN, o_ref[TS,Cout],
    #         acc_ref[TS,Cout])
    # grid = (batch, center_tiles, k_groups); k_groups is the innermost "arbitrary"
    # axis, acc_ref is the running masked max across neighbor groups.
    msg_ref, cnt_ref = refs[0], refs[1]
    o_ref = refs[2 + 2 * nlayers]
    acc_ref = refs[3 + 2 * nlayers]
    ts, cout = o_ref.shape
    kg_idx = pl.program_id(2)

    @pl.when(kg_idx == 0)
    def _():
        acc_ref[...] = jnp.full((ts, cout), _NEG, jnp.float32)

    # Grouped matmul: fold the G neighbors of this block into the M dim so the MXU
    # weight push is amortized over G*TS rows per layer (instead of per neighbor).
    h = msg_ref[...].reshape(g * ts, msg_ref.shape[-1])          # bf16
    for i in range(nlayers):
        w = refs[2 + 2 * i][...]
        b = refs[3 + 2 * i][...]
        y = jnp.dot(h, w, preferred_element_type=jnp.float32) + b
        if relu_flags[i]:
            y = jnp.maximum(y, 0.0)
        h = y.astype(jnp.bfloat16) if i < nlayers - 1 else y
    h = h.reshape(g, ts, cout)                                    # fp32

    # Mask rebuilt from per-center neighbor counts (neighbors are stored valid-first).
    cnt = cnt_ref[...]                                            # [TS, 1] int32
    base = kg_idx * g
    mx = acc_ref[...]
    for j in range(g):                                            # static, unrolled
        valid = cnt > (base + j)                                  # [TS, 1]
        mx = jnp.maximum(mx, jnp.where(valid, h[j], _NEG))
    acc_ref[...] = mx

    @pl.when(kg_idx == pl.num_programs(2) - 1)
    def _():
        res = acc_ref[...]
        # PyG scatter-max fills 0 for empty neighborhoods (and our padded centers).
        o_ref[...] = jnp.where(res <= _NEG * 0.5, 0.0, res)


def _max_over_k_kernel(h_ref, o_ref, *, k):
    # h_ref [K, TS, F] bf16 -> o_ref [TS, F] bf16 (kNN neighbors are always all valid)
    m = h_ref[0]
    for j in range(1, k):
        m = jnp.maximum(m, h_ref[j])
    o_ref[...] = m


# ----------------------------- kernel wrappers --------------------------------


def fused_mlp(x, layers, row_tile=1024, out_dtype=jnp.float32):
    """x: [N, Cin_pad] -> [N, Cout_pad]. One pallas_call for the whole MLP chain,
    weights resident (constant block index)."""
    n, cin = x.shape
    nl = len(layers)
    cout = layers[-1]["W"].shape[1]
    tr = min(row_tile, _round_up(n, 8))
    if n > 8 and _round_up(n, tr) // tr < 2:   # give both v7x TensorCores a tile
        tr = _round_up((n + 1) // 2, 8)
    n_pad = _round_up(n, tr)
    xp = jnp.pad(x.astype(jnp.bfloat16), ((0, n_pad - n), (0, 0)))

    in_specs = [pl.BlockSpec((tr, cin), lambda i: (i, 0))]
    operands = [xp]
    flops = 0
    bytes_acc = n_pad * cin * 2 + n_pad * cout * 4
    for lyr in layers:
        ci, co = lyr["W"].shape
        in_specs.append(pl.BlockSpec((ci, co), lambda i: (0, 0)))   # resident weights
        in_specs.append(pl.BlockSpec((1, co), lambda i: (0, 0)))    # resident bias
        operands += [lyr["W"], lyr["b"]]
        flops += 2 * n_pad * ci * co
        bytes_acc += ci * co * 2 + co * 4

    out = pl.pallas_call(
        functools.partial(_fused_mlp_kernel, nlayers=nl,
                          relu_flags=tuple(l["relu"] for l in layers)),
        out_shape=jax.ShapeDtypeStruct((n_pad, cout), out_dtype),
        grid=(n_pad // tr,),
        in_specs=in_specs,
        out_specs=pl.BlockSpec((tr, cout), lambda i: (i, 0)),
        compiler_params=_cparams("parallel"),
        cost_estimate=pl.CostEstimate(
            flops=int(flops), transcendentals=0, bytes_accessed=int(bytes_acc)),
    )(*operands)
    return out[:n]


def edge_mlp_max(msg, counts, layers):
    """Fused per-edge PointNetConv MLP + masked neighbor max with grouped-K matmuls.

    msg    : [B, K, S, Cin_pad] bf16, neighbor-major; for every center the first
             counts[b, s] neighbor slots are valid.
    counts : [B, S] int32
    returns: [B, S, Cout_pad] fp32
    """
    b, k, s, cin = msg.shape
    nl = len(layers)
    cout = layers[-1]["W"].shape[1]
    g = math.gcd(k, 8)                     # neighbors folded into one MXU pass
    kg = k // g
    ts = _pick_center_tile(s, g * cin * 2)
    s_pad = _round_up(s, ts)
    msg_p = jnp.pad(msg.astype(jnp.bfloat16), ((0, 0), (0, 0), (0, s_pad - s), (0, 0)))
    cnt_p = jnp.pad(counts.astype(jnp.int32), ((0, 0), (0, s_pad - s)))[..., None]

    in_specs = [
        pl.BlockSpec((None, g, ts, cin), lambda ib, i, j: (ib, j, i, 0)),
        pl.BlockSpec((None, ts, 1), lambda ib, i, j: (ib, i, 0)),
    ]
    operands = [msg_p, cnt_p]
    flops = 0
    bytes_acc = msg_p.size * 2 + cnt_p.size * 4 + b * s_pad * cout * 4
    for lyr in layers:
        ci, co = lyr["W"].shape
        in_specs.append(pl.BlockSpec((ci, co), lambda ib, i, j: (0, 0)))  # resident
        in_specs.append(pl.BlockSpec((1, co), lambda ib, i, j: (0, 0)))   # resident
        operands += [lyr["W"], lyr["b"]]
        flops += 2 * b * s_pad * k * ci * co
        bytes_acc += ci * co * 2 + co * 4

    out = pl.pallas_call(
        functools.partial(_edge_mlp_max_kernel, nlayers=nl,
                          relu_flags=tuple(l["relu"] for l in layers), g=g),
        out_shape=jax.ShapeDtypeStruct((b, s_pad, cout), jnp.float32),
        grid=(b, s_pad // ts, kg),
        in_specs=in_specs,
        out_specs=pl.BlockSpec((None, ts, cout), lambda ib, i, j: (ib, i, 0)),
        scratch_shapes=[pltpu.VMEM((ts, cout), jnp.float32)],
        compiler_params=_cparams("parallel", "parallel", "arbitrary"),
        cost_estimate=pl.CostEstimate(
            flops=int(flops), transcendentals=0, bytes_accessed=int(bytes_acc)),
    )(*operands)
    return out[:, :s]


def max_over_k(h):
    """h: [B, K, S, F] bf16 -> [B, S, F] bf16, max over the kNN neighbor axis."""
    b, k, s, f = h.shape
    ts = _pick_center_tile(s, k * f * 2, target_bytes=4 << 20)
    s_pad = _round_up(s, ts)
    h_p = jnp.pad(h.astype(jnp.bfloat16), ((0, 0), (0, 0), (0, s_pad - s), (0, 0)))
    out = pl.pallas_call(
        functools.partial(_max_over_k_kernel, k=k),
        out_shape=jax.ShapeDtypeStruct((b, s_pad, f), jnp.bfloat16),
        grid=(b, s_pad // ts),
        in_specs=[pl.BlockSpec((None, k, ts, f), lambda ib, i: (ib, 0, i, 0))],
        out_specs=pl.BlockSpec((None, ts, f), lambda ib, i: (ib, i, 0)),
        compiler_params=_cparams("parallel", "parallel"),
    )(h_p)
    return out[:, :s]


# --------------------------- MLP parameter helpers ----------------------------


def make_mlp(key, channels, plain_last=True, norm=True):
    """torch_geometric.nn.MLP equivalent, eval mode.

    Eval-mode BatchNorm (running_mean=0, running_var=1, gamma=1, beta=0) is folded
    into W/b.  Channel dims are zero-padded to multiples of 128 (lane width); the
    zero padding exactly preserves the unpadded computation.  Weights stored bf16."""
    layers = []
    n = len(channels) - 1
    for i in range(n):
        key, kw, kb = jax.random.split(key, 3)
        cin, cout = channels[i], channels[i + 1]
        w = jax.random.normal(kw, (cin, cout), jnp.float32) / math.sqrt(cin)
        b = jax.random.normal(kb, (cout,), jnp.float32) * 0.01
        is_last = i == n - 1
        use_norm = norm and not (plain_last and is_last)
        use_act = not (plain_last and is_last)
        if use_norm:
            scale = 1.0 / math.sqrt(1.0 + _BN_EPS)   # fold eval BN (shift = 0)
            w = w * scale
            b = b * scale
        cin_p = _round_up(cin, _LANE)
        cout_p = _round_up(cout, _LANE)
        wp = jnp.zeros((cin_p, cout_p), jnp.float32).at[:cin, :cout].set(w)
        bp = jnp.zeros((1, cout_p), jnp.float32).at[0, :cout].set(b)
        layers.append(dict(W=wp.astype(jnp.bfloat16), b=bp, relu=use_act, cout=cout))
    return layers


def mlp_apply_xla(x, layers):
    """Plain-XLA MLP for tiny [B, C] inputs (a kernel launch there is pure overhead)."""
    cin_p = layers[0]["W"].shape[0]
    h = jnp.pad(x, ((0, 0), (0, cin_p - x.shape[-1]))).astype(jnp.bfloat16)
    for i, lyr in enumerate(layers):
        y = jnp.dot(h, lyr["W"], preferred_element_type=jnp.float32) + lyr["b"]
        if lyr["relu"]:
            y = jnp.maximum(y, 0.0)
        h = y.astype(jnp.bfloat16) if i < len(layers) - 1 else y
    return h[:, : layers[-1]["cout"]]


# ---------------------- plain-JAX glue: fps / radius / knn --------------------


def n_fps(p, ratio):
    return max(1, int(math.ceil(p * ratio)))


def fps_indices(pos, n_samples):
    """Farthest point sampling per batch. pos: [B, P, 3] -> [B, S] int32."""
    # TODO(synk): torch_cluster fps uses random_start=True; deterministic start (0) here.
    def one(p):
        dist = jnp.sum((p - p[0]) ** 2, axis=-1)
        sel0 = jnp.zeros((n_samples,), jnp.int32)

        def body(i, carry):
            sel, d = carry
            nxt = jnp.argmax(d).astype(jnp.int32)
            sel = sel.at[i].set(nxt)
            nd = jnp.sum((p - p[nxt]) ** 2, axis=-1)
            return sel, jnp.minimum(d, nd)

        sel, _ = jax.lax.fori_loop(1, n_samples, body, (sel0, dist))
        return sel

    return jax.vmap(one)(pos)


def batched_gather(x, idx):
    """x: [B, P, C], idx: [B, ...] -> [B, ..., C]."""
    return jax.vmap(lambda xb, ib: xb[ib])(x, idx)


def radius_neighbors(pos, centers, r, max_k):
    """First max_k in-radius neighbors (same batch, index order) per center, via top_k.
    Returns neighbor indices [B, S, K] (valid slots first) and counts [B, S]."""
    b, p, _ = pos.shape
    k = min(max_k, p)
    d2 = jnp.sum((centers[:, :, None, :] - pos[:, None, :, :]) ** 2, axis=-1)  # [B,S,P]
    within = d2 <= (r * r)
    ar = jnp.arange(p, dtype=jnp.int32)
    # in-radius points score positive, decreasing with index -> top_k picks them first
    score = jnp.where(within, p - ar[None, None, :], -p - ar[None, None, :])
    _, order = jax.lax.top_k(score, k)                                          # [B,S,K]
    counts = jnp.minimum(jnp.sum(within, axis=-1), k).astype(jnp.int32)
    return order.astype(jnp.int32), counts


def knn_neighbors(pos, centers, k):
    """k nearest neighbors (same batch) of each center via top_k on -d2: [B, S, K]."""
    p = pos.shape[1]
    kk = min(k, p)
    d2 = jnp.sum((centers[:, :, None, :] - pos[:, None, :, :]) ** 2, axis=-1)
    _, order = jax.lax.top_k(-d2, kk)
    return order.astype(jnp.int32)


# ------------------------------- model modules --------------------------------


def sa_module(x, pos, ratio, r, layers, max_neighbors=64):
    """SAModule: fps -> radius graph -> PointNetConv(MLP, aggr='max'), fully fused."""
    b, p, _ = pos.shape
    s = n_fps(p, ratio)
    idx = fps_indices(pos, s)                                     # [B, S]
    centers = batched_gather(pos, idx)                            # [B, S, 3]
    nbr_idx, counts = radius_neighbors(pos, centers, r, max_neighbors)
    nbr_t = jnp.swapaxes(nbr_idx, 1, 2)                           # [B, K, S]
    # TODO(synk): the gather/concat below still materializes the K-times duplicated
    # messages in HBM; an in-kernel DMA gather would remove that traffic entirely.
    x_j = batched_gather(x.astype(jnp.bfloat16), nbr_t)           # [B, K, S, Cx]
    pos_j = batched_gather(pos, nbr_t)                            # [B, K, S, 3]
    rel = (pos_j - centers[:, None, :, :]).astype(jnp.bfloat16)
    msg = jnp.concatenate([x_j, rel], axis=-1)                    # [B, K, S, Cx+3]
    cin_p = layers[0]["W"].shape[0]
    msg = jnp.pad(msg, ((0, 0), (0, 0), (0, 0), (0, cin_p - msg.shape[-1])))
    out = edge_mlp_max(msg, counts, layers)                       # [B, S, Cout_pad]
    cout = layers[-1]["cout"]
    return out[..., :cout], centers


def transition_down(x, pos, ratio, k, layers):
    """TransitionDown: fps -> fused MLP on all points -> kNN scatter-max onto clusters."""
    b, p, cin = x.shape
    s = n_fps(p, ratio)
    idx = fps_indices(pos, s)
    centers = batched_gather(pos, idx)
    nbr_idx = knn_neighbors(pos, centers, k)                      # [B, S, K] (all valid)
    cin_p = layers[0]["W"].shape[0]
    xf = jnp.pad(x.reshape(b * p, cin).astype(jnp.bfloat16), ((0, 0), (0, cin_p - cin)))
    h = fused_mlp(xf, layers, out_dtype=jnp.bfloat16)             # [B*P, Cout_pad] bf16
    cout = layers[-1]["cout"]
    h = h[:, :cout].reshape(b, p, cout)
    h_j = batched_gather(h, jnp.swapaxes(nbr_idx, 1, 2))          # [B, K, S, Cout] bf16
    out = max_over_k(h_j)                                         # [B, S, Cout] bf16
    return out, centers


def global_sa_module(x, pos, layers):
    """GlobalSAModule: fused MLP(cat[x, pos]) then global_mean_pool over batch."""
    b, p, c = x.shape
    feat = jnp.concatenate(
        [x.astype(jnp.bfloat16), pos.astype(jnp.bfloat16)], axis=-1
    ).reshape(b * p, c + 3)
    cin_p = layers[0]["W"].shape[0]
    feat = jnp.pad(feat, ((0, 0), (0, cin_p - feat.shape[-1])))
    h = fused_mlp(feat, layers)                                   # [B*P, 1024] f32
    cout = layers[-1]["cout"]
    return jnp.mean(h[:, :cout].reshape(b, p, cout), axis=1)      # [B, 1024]


# ------------------------------- full forward ---------------------------------


def init_params(key):
    ks = jax.random.split(key, 7)
    return dict(
        sa1=make_mlp(ks[0], [3 * 2, 64, 64, 128]),
        td1=make_mlp(ks[1], [128, 256], plain_last=False),
        sa2=make_mlp(ks[2], [256 + 3, 128, 128, 256]),
        td2=make_mlp(ks[3], [256, 512], plain_last=False),
        sa3=make_mlp(ks[4], [512 + 3, 256, 512, 1024]),
        rev=make_mlp(ks[5], [1024, 256, 256, 1024]),
        # dropout=0.5 is identity in eval mode
        head=make_mlp(ks[6], [1024, 512, 256, NUM_CLASSES], norm=False),
    )


def forward(params, data, key):
    b, p, _ = data.shape
    x_flat = data.reshape(b * p, 3).astype(jnp.float32)

    # --- DiffusionNoise (forward process) ---
    # TODO(synk): torch RNG (randint/randn) replaced with jax.random; same distribution.
    kt, kn = jax.random.split(key)
    t = jax.random.randint(kt, (), 0, TIMESTEPS)
    betas = jnp.linspace(1e-4, 0.02, TIMESTEPS, dtype=jnp.float32)
    beta_t = betas[t]
    noise = jax.random.normal(kn, x_flat.shape, jnp.float32)
    # 3-wide last dim: plain JAX (a dedicated kernel would waste >97% of each vreg)
    noisy = (jnp.sqrt(1.0 - beta_t) * x_flat + jnp.sqrt(beta_t) * noise).reshape(b, p, 3)

    # sa0_out = (noisy_x, noisy_x, batch)
    x1, pos1 = sa_module(noisy, noisy, 0.5, 0.2, params["sa1"])
    x1d, pos1d = transition_down(x1, pos1, 0.25, 16, params["td1"])
    x2, pos2 = sa_module(x1d, pos1d, 0.25, 0.4, params["sa2"])
    x2d, pos2d = transition_down(x2, pos2, 0.25, 16, params["td2"])
    g_feat = global_sa_module(x2d, pos2d, params["sa3"])           # [B, 1024]

    # rev/head on [B, 1024] (B tiny): plain XLA, a Pallas launch is pure overhead here
    denoised = mlp_apply_xla(g_feat, params["rev"])                # [B, 1024]
    y = mlp_apply_xla(denoised, params["head"])                    # [B, NUM_CLASSES]
    return y


if __name__ == "__main__":
    key = jax.random.PRNGKey(0)
    kparam, kdata, kfwd = jax.random.split(key, 3)
    params = init_params(kparam)
    # data layout matches the PyTorch module: [batch, npoints, 3]
    data = jax.random.normal(kdata, (2, 16, 3), jnp.float32)
    y = forward(params, data, kfwd)
    jax.block_until_ready(y)
    assert y.shape == (2, NUM_CLASSES), y.shape
    assert bool(jnp.all(jnp.isfinite(y))), "non-finite output"
    print("KERNEL_OK")
</pallas_src>

<mosaic_0001>
module attributes {stable_mosaic.version = 11 : i64} {
  func.func @_edge_mlp_max_kernel(%arg0: i32, %arg1: i32, %arg2: i32, %arg3: memref<1x8x8x128xbf16, #tpu.memory_space<vmem>>, %arg4: memref<1x8x1xi32, #tpu.memory_space<vmem>>, %arg5: memref<128x128xbf16, #tpu.memory_space<vmem>>, %arg6: memref<1x128xf32, #tpu.memory_space<vmem>>, %arg7: memref<128x128xbf16, #tpu.memory_space<vmem>>, %arg8: memref<1x128xf32, #tpu.memory_space<vmem>>, %arg9: memref<128x128xbf16, #tpu.memory_space<vmem>>, %arg10: memref<1x128xf32, #tpu.memory_space<vmem>>, %arg11: memref<1x8x128xf32, #tpu.memory_space<vmem>>, %arg12: memref<8x128xf32, #tpu.memory_space<vmem>>) attributes {dimension_semantics = [#tpu.dimension_semantics<parallel>, #tpu.dimension_semantics<parallel>, #tpu.dimension_semantics<arbitrary>], iteration_bounds = array<i64: 2, 1, 2>, scalar_prefetch = 0 : i64, scratch_operands = 1 : i64, tpu.core_type = #tpu.core_type<tc>, window_params = [{transform_indices = @transform_0, window_bounds = array<i64: 1, 8, 8, 128>}, {transform_indices = @transform_1, window_bounds = array<i64: 1, 8, 1>}, {pipeline_mode = #tpu.pipeline_mode<synchronous>, transform_indices = @transform_2, window_bounds = array<i64: 128, 128>}, {pipeline_mode = #tpu.pipeline_mode<synchronous>, transform_indices = @transform_3, window_bounds = array<i64: 1, 128>}, {pipeline_mode = #tpu.pipeline_mode<synchronous>, transform_indices = @transform_4, window_bounds = array<i64: 128, 128>}, {pipeline_mode = #tpu.pipeline_mode<synchronous>, transform_indices = @transform_5, window_bounds = array<i64: 1, 128>}, {pipeline_mode = #tpu.pipeline_mode<synchronous>, transform_indices = @transform_6, window_bounds = array<i64: 128, 128>}, {pipeline_mode = #tpu.pipeline_mode<synchronous>, transform_indices = @transform_7, window_bounds = array<i64: 1, 128>}, {transform_indices = @transform_8, window_bounds = array<i64: 1, 8, 128>}]} {
    %c0_i32 = arith.constant 0 : i32
    %0 = arith.cmpi eq, %arg2, %c0_i32 : i32
    %1 = arith.extui %0 : i1 to i32
    %c0_i32_0 = arith.constant 0 : i32
    %2 = arith.cmpi ne, %1, %c0_i32_0 : i32
    scf.if %2 {
      %cst_38 = arith.constant -3.000000e+38 : f32
      %116 = vector.broadcast %cst_38 : f32 to vector<8x128xf32>
      %c0_39 = arith.constant 0 : index
      %c0_40 = arith.constant 0 : index
      %117 = vector.load %arg12[%c0_39, %c0_40] : memref<8x128xf32, #tpu.memory_space<vmem>>, vector<8x128xf32>
      tpu.vector_store %arg12[%c0_39, %c0_40], %116 {strides = array<i32>} : memref<8x128xf32, #tpu.memory_space<vmem>>, vector<8x128xf32>,
    } else {
    }
    %c0 = arith.constant 0 : index
    %c0_1 = arith.constant 0 : index
    %c0_2 = arith.constant 0 : index
    %c0_3 = arith.constant 0 : index
    %3 = vector.load %arg3[%c0, %c0_1, %c0_2, %c0_3] : memref<1x8x8x128xbf16, #tpu.memory_space<vmem>>, vector<1x8x8x128xbf16>
    %4 = vector.shape_cast %3 : vector<1x8x8x128xbf16> to vector<8x8x128xbf16>
    %5 = vector.shape_cast %4 : vector<8x8x128xbf16> to vector<64x128xbf16>
    %c0_4 = arith.constant 0 : index
    %c0_5 = arith.constant 0 : index
    %6 = vector.load %arg5[%c0_4, %c0_5] : memref<128x128xbf16, #tpu.memory_space<vmem>>, vector<128x128xbf16>
    %c0_6 = arith.constant 0 : index
    %c0_7 = arith.constant 0 : index
    %7 = vector.load %arg6[%c0_6, %c0_7] : memref<1x128xf32, #tpu.memory_space<vmem>>, vector<1x128xf32>
    %cst = arith.constant dense<0.000000e+00> : vector<64x128xf32>
    %8 = tpu.matmul %5, %6, %cst {dimension_numbers = #tpu.dot_dimension_numbers<[1], [0], [0], [1], [0, 0, 1, 1], [], []>} : vector<64x128xbf16>, vector<128x128xbf16>, vector<64x128xf32> -> vector<64x128xf32>
    %9 = vector.broadcast %7 : vector<1x128xf32> to vector<64x128xf32>
    %10 = arith.addf %8, %9 : vector<64x128xf32>
    %cst_8 = arith.constant 0.000000e+00 : f32
    %11 = vector.broadcast %cst_8 : f32 to vector<64x128xf32>
    %12 = arith.maximumf %10, %11 : vector<64x128xf32>
    %13 = arith.truncf %12 : vector<64x128xf32> to vector<64x128xbf16>
    %c0_9 = arith.constant 0 : index
    %c0_10 = arith.constant 0 : index
    %14 = vector.load %arg7[%c0_9, %c0_10] : memref<128x128xbf16, #tpu.memory_space<vmem>>, vector<128x128xbf16>
    %c0_11 = arith.constant 0 : index
    %c0_12 = arith.constant 0 : index
    %15 = vector.load %arg8[%c0_11, %c0_12] : memref<1x128xf32, #tpu.memory_space<vmem>>, vector<1x128xf32>
    %cst_13 = arith.constant dense<0.000000e+00> : vector<64x128xf32>
    %16 = tpu.matmul %13, %14, %cst_13 {dimension_numbers = #tpu.dot_dimension_numbers<[1], [0], [0], [1], [0, 0, 1, 1], [], []>} : vector<64x128xbf16>, vector<128x128xbf16>, vector<64x128xf32> -> vector<64x128xf32>
    %17 = vector.broadcast %15 : vector<1x128xf32> to vector<64x128xf32>
    %18 = arith.addf %16, %17 : vector<64x128xf32>
    %cst_14 = arith.constant 0.000000e+00 : f32
    %19 = vector.broadcast %cst_14 : f32 to vector<64x128xf32>
    %20 = arith.maximumf %18, %19 : vector<64x128xf32>
    %21 = arith.truncf %20 : vector<64x128xf32> to vector<64x128xbf16>
    %c0_15 = arith.constant 0 : index
    %c0_16 = arith.constant 0 : index
    %22 = vector.load %arg9[%c0_15, %c0_16] : memref<128x128xbf16, #tpu.memory_space<vmem>>, vector<128x128xbf16>
    %c0_17 = arith.constant 0 : index
    %c0_18 = arith.constant 0 : index
    %23 = vector.load %arg10[%c0_17, %c0_18] : memref<1x128xf32, #tpu.memory_space<vmem>>, vector<1x128xf32>
    %cst_19 = arith.constant dense<0.000000e+00> : vector<64x128xf32>
    %24 = tpu.matmul %21, %22, %cst_19 {dimension_numbers = #tpu.dot_dimension_numbers<[1], [0], [0], [1], [0, 0, 1, 1], [], []>} : vector<64x128xbf16>, vector<128x128xbf16>, vector<64x128xf32> -> vector<64x128xf32>
    %25 = vector.broadcast %23 : vector<1x128xf32> to vector<64x128xf32>
    %26 = arith.addf %24, %25 : vector<64x128xf32>
    %27 = vector.shape_cast %26 : vector<64x128xf32> to vector<8x8x128xf32>
    %c0_20 = arith.constant 0 : index
    %c0_21 = arith.constant 0 : index
    %c0_22 = arith.constant 0 : index
    %28 = vector.load %arg4[%c0_20, %c0_21, %c0_22] : memref<1x8x1xi32, #tpu.memory_space<vmem>>, vector<1x8x1xi32>
    %29 = vector.shape_cast %28 : vector<1x8x1xi32> to vector<8x1xi32>
    %c8_i32 = arith.constant 8 : i32
    %30 = arith.muli %arg2, %c8_i32 : i32
    %c0_23 = arith.constant 0 : index
    %c0_24 = arith.constant 0 : index
    %31 = vector.load %arg12[%c0_23, %c0_24] : memref<8x128xf32, #tpu.memory_space<vmem>>, vector<8x128xf32>
    %c0_i32_25 = arith.constant 0 : i32
    %32 = arith.addi %30, %c0_i32_25 : i32
    %33 = vector.broadcast %32 : i32 to vector<8x1xi32>
    %34 = arith.cmpi sgt, %29, %33 : vector<8x1xi32>
    %35 = vector.extract_strided_slice %27 {offsets = [0, 0, 0], sizes = [1, 8, 128], strides = [1, 1, 1]} : vector<8x8x128xf32> to vector<1x8x128xf32>
    %36 = vector.shape_cast %35 : vector<1x8x128xf32> to vector<8x128xf32>
    %cst_26 = arith.constant -3.000000e+38 : f32
    %37 = vector.shape_cast %34 : vector<8x1xi1> to vector<8x1xi1>
    %38 = vector.broadcast %37 : vector<8x1xi1> to vector<8x128xi1>
    %39 = vector.broadcast %cst_26 : f32 to vector<8x128xf32>
    %40 = arith.select %38, %36, %39 : vector<8x128xi1>, vector<8x128xf32>
    %41 = arith.maximumf %31, %40 : vector<8x128xf32>
    %c1_i32 = arith.constant 1 : i32
    %42 = arith.addi %30, %c1_i32 : i32
    %43 = vector.broadcast %42 : i32 to vector<8x1xi32>
    %44 = arith.cmpi sgt, %29, %43 : vector<8x1xi32>
    %45 = vector.extract_strided_slice %27 {offsets = [1, 0, 0], sizes = [1, 8, 128], strides = [1, 1, 1]} : vector<8x8x128xf32> to vector<1x8x128xf32>
    %46 = vector.shape_cast %45 : vector<1x8x128xf32> to vector<8x128xf32>
    %cst_27 = arith.constant -3.000000e+38 : f32
    %47 = vector.shape_cast %44 : vector<8x1xi1> to vector<8x1xi1>
    %48 = vector.broadcast %47 : vector<8x1xi1> to vector<8x128xi1>
    %49 = vector.broadcast %cst_27 : f32 to vector<8x128xf32>
    %50 = arith.select %48, %46, %49 : vector<8x128xi1>, vector<8x128xf32>
    %51 = arith.maximumf %41, %50 : vector<8x128xf32>
    %c2_i32 = arith.constant 2 : i32
    %52 = arith.addi %30, %c2_i32 : i32
    %53 = vector.broadcast %52 : i32 to vector<8x1xi32>
    %54 = arith.cmpi sgt, %29, %53 : vector<8x1xi32>
    %55 = vector.extract_strided_slice %27 {offsets = [2, 0, 0], sizes = [1, 8, 128], strides = [1, 1, 1]} : vector<8x8x128xf32> to vector<1x8x128xf32>
    %56 = vector.shape_cast %55 : vector<1x8x128xf32> to vector<8x128xf32>
    %cst_28 = arith.constant -3.000000e+38 : f32
    %57 = vector.shape_cast %54 : vector<8x1xi1> to vector<8x1xi1>
    %58 = vector.broadcast %57 : vector<8x1xi1> to vector<8x128xi1>
    %59 = vector.broadcast %cst_28 : f32 to vector<8x128xf32>
    %60 = arith.select %58, %56, %59 : vector<8x128xi1>, vector<8x128xf32>
    %61 = arith.maximumf %51, %60 : vector<8x128xf32>
    %c3_i32 = arith.constant 3 : i32
    %62 = arith.addi %30, %c3_i32 : i32
    %63 = vector.broadcast %62 : i32 to vector<8x1xi32>
    %64 = arith.cmpi sgt, %29, %63 : vector<8x1xi32>
    %65 = vector.extract_strided_slice %27 {offsets = [3, 0, 0], sizes = [1, 8, 128], strides = [1, 1, 1]} : vector<8x8x128xf32> to vector<1x8x128xf32>
    %66 = vector.shape_cast %65 : vector<1x8x128xf32> to vector<8x128xf32>
    %cst_29 = arith.constant -3.000000e+38 : f32
    %67 = vector.shape_cast %64 : vector<8x1xi1> to vector<8x1xi1>
    %68 = vector.broadcast %67 : vector<8x1xi1> to vector<8x128xi1>
    %69 = vector.broadcast %cst_29 : f32 to vector<8x128xf32>
    %70 = arith.select %68, %66, %69 : vector<8x128xi1>, vector<8x128xf32>
    %71 = arith.maximumf %61, %70 : vector<8x128xf32>
    %c4_i32 = arith.constant 4 : i32
    %72 = arith.addi %30, %c4_i32 : i32
    %73 = vector.broadcast %72 : i32 to vector<8x1xi32>
    %74 = arith.cmpi sgt, %29, %73 : vector<8x1xi32>
    %75 = vector.extract_strided_slice %27 {offsets = [4, 0, 0], sizes = [1, 8, 128], strides = [1, 1, 1]} : vector<8x8x128xf32> to vector<1x8x128xf32>
    %76 = vector.shape_cast %75 : vector<1x8x128xf32> to vector<8x128xf32>
    %cst_30 = arith.constant -3.000000e+38 : f32
    %77 = vector.shape_cast %74 : vector<8x1xi1> to vector<8x1xi1>
    %78 = vector.broadcast %77 : vector<8x1xi1> to vector<8x128xi1>
    %79 = vector.broadcast %cst_30 : f32 to vector<8x128xf32>
    %80 = arith.select %78, %76, %79 : vector<8x128xi1>, vector<8x128xf32>
    %81 = arith.maximumf %71, %80 : vector<8x128xf32>
    %c5_i32 = arith.constant 5 : i32
    %82 = arith.addi %30, %c5_i32 : i32
    %83 = vector.broadcast %82 : i32 to vector<8x1xi32>
    %84 = arith.cmpi sgt, %29, %83 : vector<8x1xi32>
    %85 = vector.extract_strided_slice %27 {offsets = [5, 0, 0], sizes = [1, 8, 128], strides = [1, 1, 1]} : vector<8x8x128xf32> to vector<1x8x128xf32>
    %86 = vector.shape_cast %85 : vector<1x8x128xf32> to vector<8x128xf32>
    %cst_31 = arith.constant -3.000000e+38 : f32
    %87 = vector.shape_cast %84 : vector<8x1xi1> to vector<8x1xi1>
    %88 = vector.broadcast %87 : vector<8x1xi1> to vector<8x128xi1>
    %89 = vector.broadcast %cst_31 : f32 to vector<8x128xf32>
    %90 = arith.select %88, %86, %89 : vector<8x128xi1>, vector<8x128xf32>
    %91 = arith.maximumf %81, %90 : vector<8x128xf32>
    %c6_i32 = arith.constant 6 : i32
    %92 = arith.addi %30, %c6_i32 : i32
    %93 = vector.broadcast %92 : i32 to vector<8x1xi32>
    %94 = arith.cmpi sgt, %29, %93 : vector<8x1xi32>
    %95 = vector.extract_strided_slice %27 {offsets = [6, 0, 0], sizes = [1, 8, 128], strides = [1, 1, 1]} : vector<8x8x128xf32> to vector<1x8x128xf32>
    %96 = vector.shape_cast %95 : vector<1x8x128xf32> to vector<8x128xf32>
    %cst_32 = arith.constant -3.000000e+38 : f32
    %97 = vector.shape_cast %94 : vector<8x1xi1> to vector<8x1xi1>
    %98 = vector.broadcast %97 : vector<8x1xi1> to vector<8x128xi1>
    %99 = vector.broadcast %cst_32 : f32 to vector<8x128xf32>
    %100 = arith.select %98, %96, %99 : vector<8x128xi1>, vector<8x128xf32>
    %101 = arith.maximumf %91, %100 : vector<8x128xf32>
    %c7_i32 = arith.constant 7 : i32
    %102 = arith.addi %30, %c7_i32 : i32
    %103 = vector.broadcast %102 : i32 to vector<8x1xi32>
    %104 = arith.cmpi sgt, %29, %103 : vector<8x1xi32>
    %105 = vector.extract_strided_slice %27 {offsets = [7, 0, 0], sizes = [1, 8, 128], strides = [1, 1, 1]} : vector<8x8x128xf32> to vector<1x8x128xf32>
    %106 = vector.shape_cast %105 : vector<1x8x128xf32> to vector<8x128xf32>
    %cst_33 = arith.constant -3.000000e+38 : f32
    %107 = vector.shape_cast %104 : vector<8x1xi1> to vector<8x1xi1>
    %108 = vector.broadcast %107 : vector<8x1xi1> to vector<8x128xi1>
    %109 = vector.broadcast %cst_33 : f32 to vector<8x128xf32>
    %110 = arith.select %108, %106, %109 : vector<8x128xi1>, vector<8x128xf32>
    %111 = arith.maximumf %101, %110 : vector<8x128xf32>
    %c0_34 = arith.constant 0 : index
    %c0_35 = arith.constant 0 : index
    %112 = vector.load %arg12[%c0_34, %c0_35] : memref<8x128xf32, #tpu.memory_space<vmem>>, vector<8x128xf32>
    tpu.vector_store %arg12[%c0_34, %c0_35], %111 {strides = array<i32>} : memref<8x128xf32, #tpu.memory_space<vmem>>, vector<8x128xf32>,
    %c1_i32_36 = arith.constant 1 : i32
    %113 = arith.cmpi eq, %arg2, %c1_i32_36 : i32
    %114 = arith.extui %113 : i1 to i32
    %c0_i32_37 = arith.constant 0 : i32
    %115 = arith.cmpi ne, %114, %c0_i32_37 : i32
    scf.if %115 {
      %c0_38 = arith.constant 0 : index
      %c0_39 = arith.constant 0 : index
      %116 = vector.load %arg12[%c0_38, %c0_39] : memref<8x128xf32, #tpu.memory_space<vmem>>, vector<8x128xf32>
      %cst_40 = arith.constant -1.500000e+38 : f32
      %117 = vector.broadcast %cst_40 : f32 to vector<8x128xf32>
      %118 = arith.cmpf ole, %116, %117 : vector<8x128xf32>
      %cst_41 = arith.constant 0.000000e+00 : f32
      %119 = vector.broadcast %cst_41 : f32 to vector<8x128xf32>
      %120 = arith.select %118, %119, %116 : vector<8x128xi1>, vector<8x128xf32>
      %c0_42 = arith.constant 0 : index
      %c0_43 = arith.constant 0 : index
      %c0_44 = arith.constant 0 : index
      %121 = vector.load %arg11[%c0_42, %c0_43, %c0_44] : memref<1x8x128xf32, #tpu.memory_space<vmem>>, vector<1x8x128xf32>
      %122 = vector.shape_cast %121 : vector<1x8x128xf32> to vector<8x128xf32>
      %123 = vector.shape_cast %120 : vector<8x128xf32> to vector<1x8x128xf32>
      tpu.vector_store %arg11[%c0_42, %c0_43, %c0_44], %123 {strides = array<i32>} : memref<1x8x128xf32, #tpu.memory_space<vmem>>, vector<1x8x128xf32>,
    } else {
    }
    return
  }
  func.func @transform_0(%arg0: i32, %arg1: i32, %arg2: i32) -> (i32, i32, i32, i32) {
    %c0_i32 = arith.constant 0 : i32
    %c0_i32_0 = arith.constant 0 : i32
    return %arg0, %arg2, %arg1, %c0_i32 : i32, i32, i32, i32
  }
  func.func @transform_1(%arg0: i32, %arg1: i32, %arg2: i32) -> (i32, i32, i32) {
    %c0_i32 = arith.constant 0 : i32
    %c0_i32_0 = arith.constant 0 : i32
    return %arg0, %arg1, %c0_i32 : i32, i32, i32
  }
  func.func @transform_2(%arg0: i32, %arg1: i32, %arg2: i32) -> (i32, i32) {
    %c0_i32 = arith.constant 0 : i32
    %c0_i32_0 = arith.constant 0 : i32
    %c0_i32_1 = arith.constant 0 : i32
    return %c0_i32, %c0_i32_0 : i32, i32
  }
  func.func @transform_3(%arg0: i32, %arg1: i32, %arg2: i32) -> (i32, i32) {
    %c0_i32 = arith.constant 0 : i32
    %c0_i32_0 = arith.constant 0 : i32
    %c0_i32_1 = arith.constant 0 : i32
    return %c0_i32, %c0_i32_0 : i32, i32
  }
  func.func @transform_4(%arg0: i32, %arg1: i32, %arg2: i32) -> (i32, i32) {
    %c0_i32 = arith.constant 0 : i32
    %c0_i32_0 = arith.constant 0 : i32
    %c0_i32_1 = arith.constant 0 : i32
    return %c0_i32, %c0_i32_0 : i32, i32
  }
  func.func @transform_5(%arg0: i32, %arg1: i32, %arg2: i32) -> (i32, i32) {
    %c0_i32 = arith.constant 0 : i32
    %c0_i32_0 = arith.constant 0 : i32
    %c0_i32_1 = arith.constant 0 : i32
    return %c0_i32, %c0_i32_0 : i32, i32
  }
  func.func @transform_6(%arg0: i32, %arg1: i32, %arg2: i32) -> (i32, i32) {
    %c0_i32 = arith.constant 0 : i32
    %c0_i32_0 = arith.constant 0 : i32
    %c0_i32_1 = arith.constant 0 : i32
    return %c0_i32, %c0_i32_0 : i32, i32
  }
  func.func @transform_7(%arg0: i32, %arg1: i32, %arg2: i32) -> (i32, i32) {
    %c0_i32 = arith.constant 0 : i32
    %c0_i32_0 = arith.constant 0 : i32
    %c0_i32_1 = arith.constant 0 : i32
    return %c0_i32, %c0_i32_0 : i32, i32
  }
  func.func @transform_8(%arg0: i32, %arg1: i32, %arg2: i32) -> (i32, i32, i32) {
    %c0_i32 = arith.constant 0 : i32
    %c0_i32_0 = arith.constant 0 : i32
    return %arg0, %arg1, %c0_i32 : i32, i32, i32
  }
}

</mosaic_0001>

<bundles_post_ra>
// kernel: tpu_custom_call.1
= control target key start
LH: loop header
LB: loop body
LE: loop exit
PB: predicated region body
PF: predicated region fallthrough
CT: control target
= control target key end

     0   :  { %s2064_s0 = inlined_call_operand.hbm [shape: bf16[2,16,8,128], index: 0, kind: input, shape index: {}]   ;;  %s2065_s1 = inlined_call_operand.vmem [shape: s32[2,8,1], index: 1, kind: input, shape index: {}]   ;;  %s2066_s2 = inlined_call_operand.hbm [shape: bf16[128,128], index: 2, kind: input, shape index: {}]   ;;  %s2067_s3 = inlined_call_operand.vmem [shape: f32[1,128], index: 3, kind: input, shape index: {}]   ;;  %s2068_s4 = inlined_call_operand.hbm [shape: bf16[128,128], index: 4, kind: input, shape index: {}]   ;;  %s2069_s5 = inlined_call_operand.vmem [shape: f32[1,128], index: 5, kind: input, shape index: {}]   ;;  %s2070_s6 = inlined_call_operand.hbm [shape: bf16[128,128], index: 6, kind: input, shape index: {}]   ;;  %s2071_s7 = inlined_call_operand.vmem [shape: f32[1,128], index: 7, kind: input, shape index: {}]   ;;  %s2072_s8 = inlined_call_operand.hbm [shape: f32[2,8,128], index: 8, kind: output, shape index: {}]  }
   0x1   :  { %2082 = sst [smem:[#allocation21_spill]] %s2066_s2 }
   0x2   :  { %2083 = sst [smem:[#allocation22_spill]] %s2067_s3 }
   0x3   :  { %2084 = sst [smem:[#allocation23_spill]] %s2068_s4 }
   0x4   :  { %2085 = sst [smem:[#allocation24_spill]] %s2069_s5 }
   0x5   :  { %2086 = sst [smem:[#allocation25_spill]] %s2070_s6 }
   0x6   :  { %2087 = sst [smem:[#allocation26_spill]] %s2071_s7 }
   0x7   :  { %2088 = sst [smem:[#allocation27_spill]] %s2072_s8 }
   0x8   :  { %13 = vsyncpa [#allocation4], 0 }
   0x9   :  { %15 = vsyncpa [#allocation4 + $0x1], 0 }
   0xa   :  { %16 = vsyncpa [#allocation7], 0 }
   0xb   :  { %17 = vsyncpa [#allocation10], 0 }
   0xc   :  { %18 = vsyncpa [#allocation5], 0 }
   0xd   :  { %20 = vsyncpa [#allocation5 + $0x1], 0  ;;  %s1771_s27 = smov 0   ;;  %s1773_s28 = smov 0  }
   0xe   :  { %s1775_s29 = smov 0   ;;  %s1777_s30 = smov 0  }
   0xf   :  { %s1779_s9 = smov 0   ;;  %s1781_s10 = smov 0  }
  0x10   :  { %s1783_s11 = smov 0   ;;  %s1785_s12 = smov 0  }
  0x11   :  { %s1787_s13 = smov 0   ;;  %s1789_s14 = smov 0  }
  0x12   :  { %s1791_s15 = smov 0  }
  0x13 LB: > { %2089 = sst [smem:[#allocation16_spill]] %s1675_s27  ;;  %s1134_s16 = sadd.s32 4294967295, %s1715_s15   ;;  %s1715_s15 = sphi %s1791_s15, %s26_s15   ;;  %s1711_s14 = sphi %s1789_s14, %s2128_s14   ;;  %s1707_s13 = sphi %s1787_s13, %s2127_s13   ;;  %s1703_s12 = sphi %s1785_s12, %s2126_s12   ;;  %s1699_s11 = sphi %s1783_s11, %s2125_s11   ;;  %s1695_s10 = sphi %s1781_s10, %s2124_s10   ;;  %s1691_s9 = sphi %s1779_s9, %s2123_s9   ;;  %s1687_s30 = sphi %s1777_s30, %s2122_s30   ;;  %s1683_s29 = sphi %s1775_s29, %s2121_s29   ;;  %s1679_s28 = sphi %s1773_s28, %s2120_s28   ;;  %s1675_s27 = sphi %s1771_s27, %s2119_s27  }
  0x14   : > { %2090 = sst [smem:[#allocation17_spill]] %s1699_s11  ;;  %s1135_s17 = sadd.s32 4294967294, %s1715_s15  }
  0x15   : > { %p69_p0 = scmp.ne.s32.totalorder %s1691_s9, %s1687_s30  ;;  %p1827_p1 = scmp.eq.s32.totalorder %s1134_s16, 0 }
  0x16   : > { %p248_p2 = scmp.ne.s32.totalorder %s1683_s29, %s1679_s28  ;;  %p249_p4 = scmp.eq.s32.totalorder %s1134_s16, 3 }
  0x17   : > { %p1836_p3 = por %p1827_p1, %p69_p0  ;;  %p254_p5 = scmp.ne.s32.totalorder %s1679_s28, %s1675_s27 }
  0x18   : > { %p255_p6 = scmp.eq.s32.totalorder %s1135_s17, 3  ;;  %p1842_p7 = por %p249_p4, %p248_p2 }
  0x19   : > { %p1136_p8 = scmp.ge.s32.totalorder %s1715_s15, 1  ;;  %p262_p10 = scmp.lt.s32.totalorder %s1715_s15, 5 }
  0x1a   : > { %s2093_s21 = scalar_select %p1842_p7, 1, 0 }
  0x1b   : > { %p1847_p9 = por %p255_p6, %p254_p5  ;;  %p1852_p11 = pnand %p1136_p8, %p262_p10 }
  0x1c   : > { %2094 = sst [smem:[#allocation18_spill]] %s2093_s21  ;;  %s1717_s24 = smov [#allocation6]  }
  0x1d   : > { %s2095_s22 = scalar_select %p1847_p9, 1, 0 }
  0x1e   : > { %s274_s25 = sshll.u32 %s1717_s24, 4  ;;  %p1330_p12 = pneg %p1852_p11  ;;  %s275_s25 = int_to_ptr.vmem [resolvable:$true] %s274_s25 }
  0x1f   : > { %2096 = sst [smem:[#allocation19_spill]] %s2095_s22  ;;  %s1718_s30 = smov [#allocation8]  }
  0x20   : > { %p1860_p13 = pnand %p1330_p12, %p1827_p1  ;;  %s290_s16 = sshll.u32 %s1718_s30, 4  ;;  %s291_s16 = int_to_ptr.vmem [resolvable:$true] %s290_s16 }
  0x21   : > { %s1719_s17 = smov [#allocation9]   ;;  %s1492_s22 = scalar_lea.vmem %s275_s25, 1024 }
  0x22   : > { %s306_s19 = sshll.u32 %s1719_s17, 4  ;;  %p1483_p0 = pneg %p1860_p13  ;;  %s307_s19 = int_to_ptr.vmem [resolvable:$true] %s306_s19 }
  0x23   : > { %p1493_p2 = scmp.ne.s32.totalorder %s275_s25, %s1492_s22  ;;  %p1500_p6 = scmp.lt.s32.totalorder %s275_s25, %s275_s25 }
  0x24   : > { %p1501_p8 = scmp.lt.s32.totalorder %s1492_s22, %s1492_s22 }
  0x25   : > { %p1495_p4 = pnand %p1493_p2, %p1483_p0 }
  0x26   : > { %p1502_p10 = por %p1501_p8, %p1500_p6 }
  0x27   : > { %p1496_p5 = pneg %p1495_p4 }
  0x29   : > { %p1503_p12 = pnand %p1502_p10, %p1496_p5 }
  0x2b   : > { %1506 = shalt.err (!%p1503_p12)
}
  0x2c   : > { %s2078_s24 = smov 64   ;;  %s2079_s30 = smov 4  }
  0x2d   : > { %s2099_s2 = sld [smem:[#allocation21_spill]]  ;;  %s1518_s8 = scalar_lea.vmem %s291_s16, 1024 }
  0x2e   : > { %p1519_p2 = scmp.ne.s32.totalorder %s291_s16, %s1518_s8  ;;  %p1526_p5 = scmp.lt.s32.totalorder %s291_s16, %s291_s16 }
  0x2f   : > { %p1527_p8 = scmp.lt.s32.totalorder %s1518_s8, %s1518_s8 }
  0x30   : > { %p1521_p4 = pnand %p1519_p2, %p1483_p0 }
  0x31   : > { %p1528_p10 = por %p1527_p8, %p1526_p5 }
  0x32   : > { %p1522_p6 = pneg %p1521_p4 }
  0x33   : > { %1333 = dma.hbm_to_vmem [thread:$0]  (!%p1860_p13), %s2099_s2, 1024, %s275_s25, [#allocation7], %s2078_s24, %s2078_s24, %s2079_s30  }
  0x34   : > { %p1529_p12 = pnand %p1528_p10, %p1522_p6 }
  0x36   : > { %1532 = shalt.err (!%p1529_p12)
}
  0x37   : > { %s2100_s4 = sld [smem:[#allocation23_spill]]  ;;  %s1544_s27 = scalar_lea.vmem %s307_s19, 1024 }
  0x38   : > { %p1545_p9 = scmp.ne.s32.totalorder %s307_s19, %s1544_s27  ;;  %p1552_p5 = scmp.lt.s32.totalorder %s307_s19, %s307_s19 }
  0x39   : > { %p1553_p6 = scmp.lt.s32.totalorder %s1544_s27, %s1544_s27 }
  0x3a   : > { %p1547_p2 = pnand %p1545_p9, %p1483_p0 }
  0x3b   : > { %p1554_p8 = por %p1553_p6, %p1552_p5 }
  0x3c   : > { %p1548_p4 = pneg %p1547_p2 }
  0x3d   : > { %1336 = dma.hbm_to_vmem [thread:$0]  (!%p1860_p13), %s2100_s4, 1024, %s291_s16, [#allocation7], %s2078_s24, %s2078_s24, %s2079_s30  }
  0x3e   : > { %p1555_p10 = pnand %p1554_p8, %p1548_p4 }
  0x40   : > { %1558 = shalt.err (!%p1555_p10)
}
  0x41   : > { %s2101_s6 = sld [smem:[#allocation25_spill]]  ;;  %s38_s25 = sadd.s32 1, %s1707_s13 }
  0x42   : > { %p39_p9 = scmp.ge.s32.totalorder %s38_s25, 2  ;;  %s45_s26 = sadd.s32 1, %s1711_s14 }
  0x43   : > { %s56_s16 = sadd.s32 1, %s1695_s10  ;;  %p63_p0 = scmp.ne.s32.totalorder %s1695_s10, %s1691_s9 }
  0x44   : > { %s2130_s25 = smov (%p39_p9, %s38_s25), 0  ;;  %s2132_s26 = smov (!%p39_p9, %s45_s26), %s1711_s14 }
  0x45   : > { %2102 = sst [smem:[#allocation20_spill]] %s2130_s25  ;;  %s50_s17 = ssub.s32 %s1707_s13, %s2130_s25 }
  0x46   : > { %p64_p12 = scmp.eq.s32.totalorder %s1715_s15, 0  ;;  %p47_p2 = scmp.ge.s32.totalorder %s2132_s26, 2 }
  0x47   : > { %1339 = dma.hbm_to_vmem [thread:$0]  (!%p1860_p13), %s2101_s6, 1024, %s307_s19, [#allocation10], %s2078_s24, %s2078_s24, %s2079_s30  }
  0x48   : > { %p1351_p4 = scmp.lt.s32.totalorder %s1715_s15, 4  ;;  %p1911_p13 = por %p64_p12, %p63_p0 }
  0x49   : > { %s323_s22 = sand.u32 1, %s1695_s10   ;;  %s2134_s26 = smov (%p47_p2, %s2132_s26), 0 }
  0x4a   : > { %s1141_s27 = sshll.u32 %s323_s22, 5  ;;  %s49_s8 = ssub.s32 %s1711_s14, %s2134_s26 }
  0x4b   : > { %s51_s21 = sor.u32 %s50_s17, %s49_s8  ;;  %p236_p5 = scmp.eq.s32.totalorder %s49_s8, 0 }
  0x4c   : > { %p54_p6 = scmp.eq.s32.totalorder %s51_s21, 0  ;;  %s1142_s24 = sshll.u32 %s1707_s13, 3 }
  0x4d   : > { %s2104_s30 = sadd.s32 1, %s1683_s29  ;;  %s1143_s6 = sshll.u32 %s1711_s14, 4 }
  0x4e   : > { %s1924_s2 = scalar_select %p236_p5, %s1683_s29, %s2104_s30  }
  0x4f   : > { %s1927_s4 = scalar_select %p54_p6, %s1695_s10, %s56_s16  }
  0x50   : > { %s327_s25 = scalar_lea.vmem [#allocation3], %s1141_s27  ;;  %s334_s5 = sadd.s32 %s1143_s6, %s1142_s24 }
  0x51   : > { %s337_s7 = sshll.u32 %s327_s25, 4  ;;  %s1144_s3 = sshll.u32 %s334_s5, 6  ;;  %s338_s7 = int_to_ptr.vmem [resolvable:$true] %s337_s7 }
  0x52   : > { %p1934_p8 = pnand %p1351_p4, %p1911_p13  ;;  %s336_s30 = scalar_lea.hbm %s2064_s0, %s1144_s3 }
  0x53   : > { %s324_s21 = scalar_lea.sflag [#allocation4], %s323_s22  ;;  %s1572_s16 = scalar_lea.vmem %s338_s7, 512 }
  0x54   : > { %p1561_p10 = pneg %p1934_p8  ;;  %p1573_p9 = scmp.ne.s32.totalorder %s338_s7, %s1572_s16 }
  0x55   : > { %s1722_s6 = smov [#allocation3]  }
  0x56   : > { %p1575_p0 = pnand %p1573_p9, %p1561_p10  ;;  %s1577_s5 = sshll.u32 %s1722_s6, 4  ;;  %s1578_s5 = int_to_ptr.vmem [resolvable:$false] %s1577_s5 }
  0x57   : > { %s1579_s24 = scalar_lea.vmem %s1578_s5, 1024  ;;  %p1580_p2 = scmp.lt.s32.totalorder %s338_s7, %s1578_s5 }
  0x58   : > { %p1576_p12 = pneg %p1575_p0  ;;  %p1581_p4 = scmp.lt.s32.totalorder %s1579_s24, %s1572_s16 }
  0x5a   : > { %p1582_p13 = por %p1581_p4, %p1580_p2 }
  0x5c   : > { %p1583_p5 = pnand %p1582_p13, %p1576_p12 }
  0x5e   : > { %1586 = shalt.err (!%p1583_p5)
}
  0x5f   : > { %s2106_s25 = smov 4   ;;  %s2107_s3 = smov 64  }
  0x60   : > { %1343 = dma.hbm_to_vmem [thread:$0]  (!%p1934_p8), %s336_s30, 512, %s338_s7, %s324_s21, %s2107_s3, %s2107_s3, %s2106_s25  }
  0x61   : > { %359 = sbr.rel (%p1852_p11) target bundleno = 818 (0x332), region = 52  ;;  %s361_s19 = sand.u32 (!%p1852_p11), 1, %s1691_s9  }
  0x62   : > { %s1146_s22 = sshll.u32 (!%p1852_p11), %s361_s19, 5  ;;  %s362_s27 = scalar_lea.sflag (!%p1852_p11), [#allocation4], %s361_s19 }
  0x63   : > { %s1951_s17 = scalar_lea.vmem (!%p1852_p11), [#allocation3], %s1146_s22 }
  0x66   : > { %1658 = dma.done.wait (%p1836_p3), %s362_s27, 512  }
  0x67   : > { %1660 = vsyncadd (%p1836_p3), %s362_s27, 4294966784 }
  0x68   : > { %1662 = dma.done.wait (%p1827_p1), [#allocation7], 2048  }
  0x69   : > { %1664 = vsyncadd (%p1827_p1), [#allocation7], 4294965248 }
  0x6a   : > { %1666 = dma.done.wait (%p1827_p1), [#allocation10], 1024  }
  0x6b   : > { %1668 = vsyncadd (%p1827_p1), [#allocation10], 4294966272  ;;  %s414_s7 = sand.u32 1, %s1679_s28   ;;  %p418_p11 = scmp.lt.s32.totalorder %s1703_s12, 1 }
  0x6c   : > { %s1969_s11 = sshll.u32 %s414_s7, 3  ;;  %s2108_s18 = sld [smem:[#allocation17_spill]] }
  0x6d   : > { %s419_s20 = scalar_select %p418_p11, %s1703_s12, 1 }
  0x6e   : > { %s416_s16 = scalar_lea.vmem [#allocation11], %s1969_s11 }
  0x6f   : > { %s1151_s23 = sshll.u32 %s419_s20, 3 }
  0x70   : > { %s1975_s21 = scalar_lea.vmem %s2065_s1, %s1151_s23 }
  0x72   : > { %p1152_p1 = scmp.ne.s32.totalorder %s2108_s18, 0 }
  0x74   : > { %429 = sbr.rel (%p1152_p1) target bundleno = 123 (0x7b), region = 72 }
  0x79   : > { %v1723_v0 = vmov -3e+38  }
  0x7a   : > { %430 = vst [vmem:[#allocation2] sm:$0xff] %v1723_v0 }
  0x7b PF: > { %v1453_v1 = vld [vmem:[#allocation6 + $0x38] sm:$0xff]   ;;  %v1454_v2 = vld [vmem:[#allocation6 + $0x30] sm:$0xff]   ;;  %v1455_v3 = vld [vmem:[#allocation6 + $0x28] sm:$0xff]   ;;  %s2109_s24 = sld [smem:[#allocation22_spill]]  ;;  %v1724_v59 = vmov 0  }
  0x7c   : > { %1226 = vmatprep.subr.bf16.mxu0 %v1453_v1  ;;  %v1456_v4 = vld [vmem:[#allocation6 + $0x20] sm:$0xff]   ;;  %v1457_v6 = vld [vmem:[#allocation6 + $0x18] sm:$0xff]   ;;  %v1466_v8 = vld [vmem:[#allocation8 + $0x30] sm:$0xff]   ;;  %s2110_s25 = sld [smem:[#allocation17_spill]]  ;;  %1451 = vset.pattern.permute.xlu0 %v1724_v59 }
  0x7d   : > { %1227 = vmatpush3.bf16.msra.mxu0 %v1453_v1  ;;  %v1461_v5 = vld [vmem:[%s1951_s17] sm:$0xff]   ;;  %v1465_v7 = vld [vmem:[#allocation8 + $0x38] sm:$0xff]   ;;  %v1458_v9 = vld [vmem:[#allocation6 + $0x10] sm:$0xff]   ;;  %1452 = vset.pattern.permute.xlu1 %v1724_v59  ;;  %s2111_s18 = sld [smem:[#allocation24_spill]] }
  0x7e   : > { %1228 = vmatprep.subr.bf16.mxu0 %v1454_v2  ;;  %1242 = vmatprep.mubr.bf16.mxu0 %v1461_v5  ;;  %v1467_v10 = vld [vmem:[#allocation8 + $0x28] sm:$0xff]   ;;  %v1468_v12 = vld [vmem:[#allocation8 + $0x20] sm:$0xff]   ;;  %v1469_v14 = vld [vmem:[#allocation8 + $0x18] sm:$0xff]  }
  0x7f   : > { %1250 = vmatprep.subr.bf16.mxu1 %v1465_v7  ;;  %v1459_v11 = vld [vmem:[#allocation6 + $0x8] sm:$0xff]   ;;  %v1460_v13 = vld [vmem:[#allocation6] sm:$0xff]   ;;  %v1463_v16 = vld [vmem:[%s1951_s17 + $0x10] sm:$0xff]  }
  0x80   : > { %1251 = vmatpush3.bf16.msra.mxu1 %v1465_v7  ;;  %v1462_v15 = vld [vmem:[%s1951_s17 + $0x8] sm:$0xff]   ;;  %v1464_v17 = vld [vmem:[%s1951_s17 + $0x18] sm:$0xff]   ;;  %v1470_v18 = vld [vmem:[#allocation8 + $0x10] sm:$0xff]  }
  0x81   : > { %1229 = vmatpush3.bf16.msra.mxu0 %v1454_v2  ;;  %1252 = vmatprep.subr.bf16.mxu1 %v1466_v8  ;;  %v1471_v19 = vld [vmem:[#allocation8 + $0x8] sm:$0xff]   ;;  %v1472_v20 = vld [vmem:[#allocation8] sm:$0xff]   ;;  %v1473_v21 = vld [vmem:[#allocation9 + $0x38] sm:$0xff]  }
  0x82   : > { %1230 = vmatprep.subr.bf16.mxu0 %v1455_v3  ;;  %v1474_v22 = vld [vmem:[#allocation9 + $0x30] sm:$0xff]   ;;  %v1475_v23 = vld [vmem:[#allocation9 + $0x28] sm:$0xff]   ;;  %v1476_v24 = vld [vmem:[#allocation9 + $0x20] sm:$0xff]   ;;  %s1988_s3 = sshll.u32 %s2110_s25, 3  ;;  %p1185_p3 = scmp.ne.s32.totalorder %s2110_s25, 1 }
  0x83   : > { %v1477_v25 = vld [vmem:[#allocation9 + $0x18] sm:$0xff]   ;;  %v1478_v55 = vld [vmem:[#allocation9 + $0x10] sm:$0xff]   ;;  %v1479_v56 = vld [vmem:[#allocation9 + $0x8] sm:$0xff]   ;;  %v898_v60 = vstv %s1988_s3  ;;  %s917_s19 = sadd.s32 2, %s1988_s3  ;;  %s907_s22 = sadd.s32 1, %s1988_s3 }
  0x84   : > { %1253 = vmatpush3.bf16.msra.mxu1 %v1466_v8  ;;  %v1153_v28 = vld [vmem:[%s2109_s24] ss:$0 sm:$0xff]  ;;  %v1480_v57 = vld [vmem:[#allocation9] sm:$0xff]   ;;  %v918_v61 = vstv %s917_s19  ;;  %v908_v62 = vstv %s907_s22  ;;  %s927_s27 = sadd.s32 3, %s1988_s3  ;;  %s937_s17 = sadd.s32 4, %s1988_s3 }
  0x85   : > { %1231 = vmatpush3.bf16.msra.mxu0 %v1455_v3  ;;  %1254 = vmatprep.subr.bf16.mxu1 %v1467_v10  ;;  %v895_v58 = vld [vmem:[%s1975_s21] sm:$0xff]  ;;  %v928_v0 = vstv %s927_s27  ;;  %s947_s20 = sadd.s32 5, %s1988_s3  ;;  %v938_v2 = vstv %s937_s17  ;;  %s957_s23 = sadd.s32 6, %s1988_s3 }
  0x86   : > { %1232 = vmatprep.subr.bf16.mxu0 %v1456_v4  ;;  %vm899_vm0 = vcmp.gt.s32.totalorder %v895_v58, %v898_v60  ;;  %vm919_vm1 = vcmp.gt.s32.totalorder %v895_v58, %v918_v61  ;;  %vm909_vm2 = vcmp.gt.s32.totalorder %v895_v58, %v908_v62  ;;  %vm929_vm3 = vcmp.gt.s32.totalorder %v895_v58, %v928_v0  ;;  %s967_s8 = sadd.s32 7, %s1988_s3  ;;  %s2112_s24 = sld [smem:[#allocation26_spill]] }
  0x87   : > { %v900_v63 = vsel %vm899_vm0, 1, %v1724_v59  ;;  %v920_v1 = vsel %vm919_vm1, 1, %v1724_v59  ;;  %v910_v3 = vsel %vm909_vm2, 1, %v1724_v59  ;;  %v930_v5 = vsel %vm929_vm3, 1, %v1724_v59 }
  0x88   : > { %1255 = vmatpush3.bf16.msra.mxu1 %v1467_v10  ;;  %902 = vperm.xlu0 %1451, %v900_v63   ;;  %vm939_vm4 = vcmp.gt.s32.totalorder %v895_v58, %v938_v2  ;;  %v968_v7 = vstv %s967_s8 }
  0x89   : > { %1233 = vmatpush3.bf16.msra.mxu0 %v1456_v4  ;;  %1256 = vmatprep.subr.bf16.mxu1 %v1468_v12  ;;  %v948_v4 = vstv %s947_s20  ;;  %v940_v8 = vsel %vm939_vm4, 1, %v1724_v59  ;;  %vm969_vm7 = vcmp.gt.s32.totalorder %v895_v58, %v968_v7 }
  0x8a   : > { %1234 = vmatprep.subr.bf16.mxu0 %v1457_v6  ;;  %922 = vperm.xlu1 %1452, %v920_v1   ;;  %vm949_vm5 = vcmp.gt.s32.totalorder %v895_v58, %v948_v4 }
  0x8c   : > { %1257 = vmatpush3.bf16.msra.mxu1 %v1468_v12  ;;  %912 = vperm.xlu0 %1451, %v910_v3  }
  0x8d   : > { %1235 = vmatpush3.bf16.msra.mxu0 %v1457_v6  ;;  %1258 = vmatprep.subr.bf16.mxu1 %v1469_v14  ;;  %v958_v6 = vstv %s957_s23 }
  0x8e   : > { %1236 = vmatprep.subr.bf16.mxu0 %v1458_v9  ;;  %932 = vperm.xlu1 %1452, %v930_v5   ;;  %vm959_vm6 = vcmp.gt.s32.totalorder %v895_v58, %v958_v6 }
  0x8f   : > { %v960_v10 = vsel %vm959_vm6, 1, %v1724_v59 }
  0x90   : > { %1259 = vmatpush3.bf16.msra.mxu1 %v1469_v14  ;;  %942 = vperm.xlu0 %1451, %v940_v8   ;;  %v1166_v14 = vld [vmem:[%s2111_s18] ss:$0 sm:$0xff] }
  0x91   : > { %1237 = vmatpush3.bf16.msra.mxu0 %v1458_v9  ;;  %1260 = vmatprep.subr.bf16.mxu1 %v1470_v18  ;;  %v950_v9 = vsel %vm949_vm5, 1, %v1724_v59 }
  0x92   : > { %1238 = vmatprep.subr.bf16.mxu0 %v1459_v11  ;;  %952 = vperm.xlu1 %1452, %v950_v9  }
  0x94   : > { %1261 = vmatpush3.bf16.msra.mxu1 %v1470_v18  ;;  %962 = vperm.xlu0 %1451, %v960_v10  }
  0x95   : > { %1239 = vmatpush3.bf16.msra.mxu0 %v1459_v11  ;;  %1262 = vmatprep.subr.bf16.mxu1 %v1471_v19  ;;  %v970_v11 = vsel %vm969_vm7, 1, %v1724_v59 }
  0x96   : > { %1240 = vmatprep.subr.bf16.mxu0 %v1460_v13  ;;  %972 = vperm.xlu1 %1452, %v970_v11  }
  0x98   : > { %1263 = vmatpush3.bf16.msra.mxu1 %v1471_v19 }
  0x99   : > { %1241 = vmatpush3.bf16.msra.mxu0 %v1460_v13  ;;  %1264 = vmatprep.subr.bf16.mxu1 %v1472_v20 }
  0x9a   : > { %1274 = vmatprep.subr.bf16.mxu0 %v1473_v21 }
  0x9c   : > { %1243 = vmatmul.mubr.bf16.vlgmr.msra.gmra.mxu0 %v1462_v15  ;;  %1265 = vmatpush3.bf16.msra.mxu1 %v1472_v20 }
  0x9d   : > { %1246 = vmatprep.mubr.bf16.mxu0 %v1463_v16  ;;  %1298 = vmatprep.subr.bf16.mxu1 %v1473_v21 }
  0x9e   : > { %1275 = vmatpush3.bf16.msra.mxu0 %v1473_v21 }
  0x9f   : > { %1276 = vmatprep.subr.bf16.mxu0 %v1474_v22 }
  0xa2   : > { %1277 = vmatpush3.bf16.msra.mxu0 %v1474_v22 }
  0xa3   : > { %1278 = vmatprep.subr.bf16.mxu0 %v1475_v23 }
  0xa4   : > { %1247 = vmatmul.mubr.bf16.gmra.mxu0 %v1464_v17 }
  0xa6   : > { %1279 = vmatpush3.bf16.msra.mxu0 %v1475_v23 }
  0xa7   : > { %1280 = vmatprep.subr.bf16.mxu0 %v1476_v24 }
  0xaa   : > { %1281 = vmatpush3.bf16.msra.mxu0 %v1476_v24 }
  0xab   : > { %1282 = vmatprep.subr.bf16.mxu0 %v1477_v25 }
  0xae   : > { %1283 = vmatpush3.bf16.msra.mxu0 %v1477_v25 }
  0xaf   : > { %1284 = vmatprep.subr.bf16.mxu0 %v1478_v55 }
  0xb2   : > { %1285 = vmatpush3.bf16.msra.mxu0 %v1478_v55 }
  0xb3   : > { %1286 = vmatprep.subr.bf16.mxu0 %v1479_v56 }
  0xb6   : > { %1287 = vmatpush3.bf16.msra.mxu0 %v1479_v56 }
  0xb7   : > { %1288 = vmatprep.subr.bf16.mxu0 %v1480_v57 }
  0xba   : > { %1289 = vmatpush3.bf16.msra.mxu0 %v1480_v57 }
 0x15c   : > { %v1244_v26 = vpop.f32.mrf.mxu0 }
 0x15d   : > { %v577_v32 = vadd.f32 %v1244_v26, %v1153_v28 }
 0x15e   : > { %v568_v27 = vpop.f32.mrf.mxu0 }
 0x15f   : > { %v569_v30 = vadd.f32 %v1153_v28, %v568_v27  ;;  %v601_v39 = vmax.f32 %v577_v32, 0.0 }
 0x160   : > { %v1245_v29 = vpop.f32.mrf.mxu0 }
 0x161   : > { %v580_v31 = vadd.f32 %v1245_v29, %v1153_v28  ;;  %v599_v37 = vmax.f32 %v569_v30, 0.0 }
 0x162   : > { %v571_v33 = vpop.f32.mrf.mxu0 }
 0x163   : > { %v572_v34 = vadd.f32 %v1153_v28, %v571_v33  ;;  %v602_v35 = vmax.f32 %v580_v31, 0.0 }
 0x164   : > { %v1248_v36 = vpop.f32.mrf.mxu0 }
 0x165   : > { %v600_v38 = vmax.f32 %v572_v34, 0.0  ;;  %v608_v42 = vpack.c.bf16 %v602_v35, %v601_v39  ;;  %v593_v46 = vadd.f32 %v1248_v36, %v1153_v28 }
 0x166   : > { %v584_v40 = vpop.f32.mrf.mxu0 }
 0x167   : > { %v607_v41 = vpack.c.bf16 %v600_v38, %v599_v37  ;;  %v585_v44 = vadd.f32 %v1153_v28, %v584_v40  ;;  %v605_v52 = vmax.f32 %v593_v46, 0.0 }
 0x168   : > { %v1249_v43 = vpop.f32.mrf.mxu0 }
 0x169   : > { %v596_v45 = vadd.f32 %v1249_v43, %v1153_v28  ;;  %1266 = vmatprep.mubr.bf16.mxu1 %v607_v41  ;;  %v603_v50 = vmax.f32 %v585_v44, 0.0  ;;  %v903_v41 = vpop.permute.xlu0 %902  ;;  %v1175_v44 = vld [vmem:[%s2112_s24] ss:$0 sm:$0xff] }
 0x16a   : > { %v587_v47 = vpop.f32.mrf.mxu0  ;;  %1267 = vmatmul.mubr.bf16.vlgmr.msra.gmra.mxu1 %v608_v42  ;;  %v923_v42 = vpop.permute.xlu1 %922  ;;  %vm904_vm8 = vcmp.eq.s32.totalorder %v903_v41, 1 }
 0x16b   : > { %v588_v48 = vadd.f32 %v1153_v28, %v587_v47  ;;  %1306 = vmatpush3.bf16.msra.mxu1 %v1473_v21  ;;  %v606_v49 = vmax.f32 %v596_v45, 0.0  ;;  %vm924_vm9 = vcmp.eq.s32.totalorder %v923_v42, 1 }
 0x16c   : > { %1299 = vmatprep.subr.bf16.mxu1 %v1474_v22 }
 0x16d   : > { %v604_v51 = vmax.f32 %v588_v48, 0.0  ;;  %v610_v54 = vpack.c.bf16 %v606_v49, %v605_v52  ;;  %v913_v46 = vpop.permute.xlu0 %912 }
 0x16e   : > { %v933_v49 = vpop.permute.xlu1 %932  ;;  %vm914_vm10 = vcmp.eq.s32.totalorder %v913_v46, 1 }
 0x16f   : > { %v609_v53 = vpack.c.bf16 %v604_v51, %v603_v50  ;;  %1307 = vmatpush3.bf16.msra.mxu1 %v1474_v22  ;;  %v897_v50 = vld [vmem:[#allocation2] sm:$0xff]  ;;  %vm934_vm11 = vcmp.eq.s32.totalorder %v933_v49, 1 }
 0x170   : > { %1300 = vmatprep.subr.bf16.mxu1 %v1475_v23 }
 0x171   : > { %1270 = vmatprep.mubr.bf16.mxu1 %v609_v53 }
 0x172   : > { %1271 = vmatmul.mubr.bf16.gmra.mxu1 %v610_v54  ;;  %v953_v63 = vpop.permute.xlu1 %952 }
 0x173   : > { %1308 = vmatpush3.bf16.msra.mxu1 %v1475_v23  ;;  %vm954_vm13 = vcmp.eq.s32.totalorder %v953_v63, 1 }
 0x174   : > { %1301 = vmatprep.subr.bf16.mxu1 %v1476_v24 }
 0x176   : > { %v973_v11 = vpop.permute.xlu1 %972 }
 0x177   : > { %1309 = vmatpush3.bf16.msra.mxu1 %v1476_v24  ;;  %vm974_vm15 = vcmp.eq.s32.totalorder %v973_v11, 1 }
 0x178   : > { %1302 = vmatprep.subr.bf16.mxu1 %v1477_v25 }
 0x17b   : > { %1310 = vmatpush3.bf16.msra.mxu1 %v1477_v25 }
 0x17c   : > { %1303 = vmatprep.subr.bf16.mxu1 %v1478_v55 }
 0x17f   : > { %1311 = vmatpush3.bf16.msra.mxu1 %v1478_v55 }
 0x180   : > { %1304 = vmatprep.subr.bf16.mxu1 %v1479_v56 }
 0x183   : > { %1312 = vmatpush3.bf16.msra.mxu1 %v1479_v56 }
 0x184   : > { %1305 = vmatprep.subr.bf16.mxu1 %v1480_v57 }
 0x187   : > { %1313 = vmatpush3.bf16.msra.mxu1 %v1480_v57  ;;  %v943_v57 = vpop.permute.xlu0 %942 }
 0x188   : > { %vm944_vm12 = vcmp.eq.s32.totalorder %v943_v57, 1 }
 0x18b   : > { %v963_v6 = vpop.permute.xlu0 %962 }
 0x18c   : > { %vm964_vm14 = vcmp.eq.s32.totalorder %v963_v6, 1 }
 0x22a   : > { %v1268_v12 = vpop.f32.mrf.mxu1 }
 0x22b   : > { %v725_v18 = vadd.f32 %v1268_v12, %v1166_v14 }
 0x22c   : > { %v716_v13 = vpop.f32.mrf.mxu1 }
 0x22d   : > { %v717_v16 = vadd.f32 %v1166_v14, %v716_v13  ;;  %v749_v25 = vmax.f32 %v725_v18, 0.0 }
 0x22e   : > { %v1269_v15 = vpop.f32.mrf.mxu1 }
 0x22f   : > { %v728_v17 = vadd.f32 %v1269_v15, %v1166_v14  ;;  %v747_v23 = vmax.f32 %v717_v16, 0.0 }
 0x230   : > { %v719_v19 = vpop.f32.mrf.mxu1 }
 0x231   : > { %v720_v20 = vadd.f32 %v1166_v14, %v719_v19  ;;  %v750_v21 = vmax.f32 %v728_v17, 0.0 }
 0x232   : > { %v1272_v22 = vpop.f32.mrf.mxu1 }
 0x233   : > { %v748_v24 = vmax.f32 %v720_v20, 0.0  ;;  %v756_v28 = vpack.c.bf16 %v750_v21, %v749_v25  ;;  %v741_v32 = vadd.f32 %v1272_v22, %v1166_v14 }
 0x234   : > { %v732_v26 = vpop.f32.mrf.mxu1 }
 0x235   : > { %v755_v27 = vpack.c.bf16 %v748_v24, %v747_v23  ;;  %v733_v30 = vadd.f32 %v1166_v14, %v732_v26  ;;  %v753_v38 = vmax.f32 %v741_v32, 0.0 }
 0x236   : > { %v1273_v29 = vpop.f32.mrf.mxu1 }
 0x237   : > { %v744_v31 = vadd.f32 %v1273_v29, %v1166_v14  ;;  %1290 = vmatprep.mubr.bf16.mxu0 %v755_v27  ;;  %v751_v36 = vmax.f32 %v733_v30, 0.0 }
 0x238   : > { %v735_v33 = vpop.f32.mrf.mxu1  ;;  %1291 = vmatmul.mubr.bf16.vlgmr.msra.gmra.mxu0 %v756_v28 }
 0x239   : > { %v736_v34 = vadd.f32 %v1166_v14, %v735_v33  ;;  %v754_v35 = vmax.f32 %v744_v31, 0.0 }
 0x23b   : > { %v752_v37 = vmax.f32 %v736_v34, 0.0  ;;  %v758_v40 = vpack.c.bf16 %v754_v35, %v753_v38 }
 0x23d   : > { %v757_v39 = vpack.c.bf16 %v752_v37, %v751_v36 }
 0x23f   : > { %1294 = vmatprep.mubr.bf16.mxu1 %v757_v39 }
 0x240   : > { %1295 = vmatmul.mubr.bf16.vlgmr.msra.gmra.mxu1 %v758_v40 }
 0x2f8   : > { %v1292_v43 = vpop.f32.mrf.mxu0 }
 0x2f9   : > { %v873_v53 = vadd.f32 %v1292_v43, %v1175_v44 }
 0x2fa   : > { %v864_v45 = vpop.f32.mrf.mxu0 }
 0x2fb   : > { %v865_v47 = vadd.f32 %v1175_v44, %v864_v45  ;;  %v925_v62 = vsel %vm924_vm9, %v873_v53, -3e+38 }
 0x2fc   : > { %v1293_v48 = vpop.f32.mrf.mxu0 }
 0x2fd   : > { %v905_v51 = vsel %vm904_vm8, %v865_v47, -3e+38  ;;  %v876_v58 = vadd.f32 %v1293_v48, %v1175_v44 }
 0x2fe   : > { %v867_v52 = vpop.f32.mrf.mxu0  ;;  %v906_v55 = vmax.f32 %v897_v50, %v905_v51 }
 0x2ff   : > { %v868_v54 = vadd.f32 %v1175_v44, %v867_v52  ;;  %v935_v3 = vsel %vm934_vm11, %v876_v58, -3e+38 }
 0x300   : > { %v1296_v56 = vpop.f32.mrf.mxu1 }
 0x301   : > { %v915_v59 = vsel %vm914_vm10, %v868_v54, -3e+38  ;;  %v889_v7 = vadd.f32 %v1296_v56, %v1175_v44 }
 0x302   : > { %v916_v60 = vmax.f32 %v906_v55, %v915_v59  ;;  %v880_v61 = vpop.f32.mrf.mxu1 }
 0x303   : > { %v881_v0 = vadd.f32 %v1175_v44, %v880_v61  ;;  %v965_v15 = vsel %vm964_vm14, %v889_v7, -3e+38 }
 0x304   : > { %v926_v1 = vmax.f32 %v916_v60, %v925_v62  ;;  %v1297_v2 = vpop.f32.mrf.mxu1 }
 0x305   : > { %v945_v8 = vsel %vm944_vm12, %v881_v0, -3e+38  ;;  %v892_v12 = vadd.f32 %v1297_v2, %v1175_v44 }
 0x306   : > { %v936_v4 = vmax.f32 %v926_v1, %v935_v3  ;;  %v883_v5 = vpop.f32.mrf.mxu1 }
 0x307   : > { %v884_v9 = vadd.f32 %v1175_v44, %v883_v5  ;;  %v975_v17 = vsel %vm974_vm15, %v892_v12, -3e+38 }
 0x308   : > { %v946_v10 = vmax.f32 %v936_v4, %v945_v8 }
 0x309   : > { %v955_v13 = vsel %vm954_vm13, %v884_v9, -3e+38 }
 0x30a   : > { %v956_v14 = vmax.f32 %v946_v10, %v955_v13 }
 0x30c   : > { %v966_v16 = vmax.f32 %v956_v14, %v965_v15  ;;  %981 = sbr.rel (%p1185_p3) target bundleno = 795 (0x31b), region = 76 }
 0x30e   : > { %v976_v18 = vmax.f32 %v966_v16, %v975_v17 }
 0x310   : > { %977 = vst [vmem:[#allocation2] sm:$0xff] %v976_v18 }
 0x317   : > { %v982_v19 = vld [vmem:[#allocation2] sm:$0xff] }
 0x318   : > { %vm983_vm0 = vcmp.le.f32.partialorder %v982_v19, -1.5e+38 }
 0x319   : > { %v984_v20 = vsel %vm983_vm0, 0.0, %v982_v19 }
 0x31a   : > { %985 = vst [vmem:[%s416_s16] sm:$0xff] %v984_v20 }
 0x31b PF: > { %s1187_s19 = sshll.u32 %s1703_s12, 7  ;;  %s2114_s17 = sld [smem:[#allocation27_spill]] }
 0x31c   : > { %s1001_s23 = sshll.u32 %s416_s16, 4  ;;  %s987_s25 = scalar_lea.sflag [#allocation5], %s414_s7  ;;  %s1002_s23 = int_to_ptr.vmem [resolvable:$true] %s1001_s23 }
 0x31d   : > { %s1587_s8 = scalar_lea.vmem %s1002_s23, 128  ;;  %s1725_s30 = smov [#allocation11]  }
 0x31e   : > { %p1588_p6 = scmp.ne.s32.totalorder %s1002_s23, %s1587_s8  ;;  %s1591_s21 = sshll.u32 %s1725_s30, 4  ;;  %s1592_s21 = int_to_ptr.vmem [resolvable:$false] %s1591_s21 }
 0x31f   : > { %s1593_s18 = scalar_lea.vmem %s1592_s21, 256  ;;  %p1594_p9 = scmp.lt.s32.totalorder %s1002_s23, %s1592_s21 }
 0x320   : > { %p1589_p8 = pnand %p1588_p6, %p1842_p7  ;;  %p1595_p0 = scmp.lt.s32.totalorder %s1593_s18, %s1587_s8 }
 0x321   : > { %s999_s20 = scalar_lea.hbm %s2114_s17, %s1187_s19 }
 0x322   : > { %p1590_p10 = pneg %p1589_p8  ;;  %p1596_p12 = por %p1595_p0, %p1594_p9 }
 0x324   : > { %p1597_p2 = pnand %p1596_p12, %p1590_p10 }
 0x326   : > { %1600 = shalt.err (!%p1597_p2)
}
 0x327   : > { %s1601_s12 = scalar_lea.hbm %s999_s20, 128  ;;  %s1605_s16 = scalar_lea.hbm %s2114_s17, 256 }
 0x328   : > { %p1602_p4 = scmp.ne.s32.totalorder %s999_s20, %s1601_s12  ;;  %p1606_p11 = scmp.lt.s32.totalorder %s999_s20, %s2114_s17 }
 0x329   : > { %p1607_p1 = scmp.lt.s32.totalorder %s1605_s16, %s1601_s12 }
 0x32a   : > { %p1603_p13 = pnand %p1602_p4, %p1842_p7 }
 0x32b   : > { %p1608_p3 = por %p1607_p1, %p1606_p11 }
 0x32c   : > { %p1604_p5 = pneg %p1603_p13 }
 0x32e   : > { %p1609_p6 = pnand %p1608_p3, %p1604_p5 }
 0x330   : > { %1612 = shalt.err (!%p1609_p6)
}
 0x331   : > { %1328 = dma.vmem_to_hbm [thread:$0]  (%p1842_p7), %s1002_s23, 128, %s999_s20, %s987_s25  }
 0x332 PF: > { %s2115_s24 = sld [smem:[#allocation16_spill]]  ;;  %p1355_p8 = scmp.ge.s32.totalorder %s1715_s15, 2 }
 0x333   : > { %s2116_s19 = sld [smem:[#allocation19_spill]] }
 0x338   : > { %s1013_s22 = sand.u32 1, %s2115_s24  }
 0x339   : > { %p2117_p10 = scmp.ne.s32.totalorder %s2116_s19, 0  ;;  %s1014_s27 = scalar_lea.sflag [#allocation5], %s1013_s22 }
 0x33b   : > { %p1345_p9 = pnand %p1355_p8, %p2117_p10 }
 0x33d   : > { %p1346_p0 = pneg %p1345_p9 }
 0x33f   : > { %1670 = dma.done.wait (%p1346_p0), %s1014_s27, 128  }
 0x340   : > { %1672 = vsyncadd (%p1346_p0), %s1014_s27, 4294967168  ;;  %s26_s15 = sadd.s32 1, %s1715_s15   ;;  %s2118_s3 = sld [smem:[#allocation20_spill]] }
 0x341   : > { %p23_p12 = scmp.ge.s32.totalorder %s26_s15, 6   ;;  %s2119_s27 = smov %s1679_s28 }
 0x342   : > { %s2120_s28 = smov %s1683_s29  ;;  %s2121_s29 = smov %s1924_s2 }
 0x343   : > { %s2122_s30 = smov %s1691_s9  ;;  %s2123_s9 = smov %s1695_s10 }
 0x344   : > { %s2124_s10 = smov %s1927_s4  ;;  %s2125_s11 = smov %s1707_s13 }
 0x345   : > { %s2126_s12 = smov %s1711_s14  ;;  %s2128_s14 = smov %s2134_s26 }
 0x346   : > { %s2127_s13 = smov %s2118_s3  ;;  %25 = sbr.rel (!%p23_p12) target bundleno = 19 (0x13), region = 120 }
 0x34b   :  { %1019 = vsyncpa [#allocation4], 1 }
 0x34c   :  { %1021 = vsyncpa [#allocation4 + $0x1], 1 }
 0x34d   :  { %1022 = vsyncpa [#allocation7], 1 }
 0x34e   :  { %1023 = vsyncpa [#allocation10], 1 }
 0x34f   :  { %1024 = vsyncpa [#allocation5], 1 }
 0x350   :  { %1026 = vsyncpa [#allocation5 + $0x1], 1 }

</bundles_post_ra>
